<compile_context>
chip_gen: v7x
topology: tpu7x:2x2x1
jax: 0.10.0
libtpu: 0.0.40
codegen_flags: <defaults>
</compile_context>

<pallas_src>
import functools
import math

import jax
import jax.numpy as jnp
from jax.experimental import pallas as pl
from jax.experimental.pallas import tpu as pltpu

_LN_EPS = 1e-5
_BN_EPS = 1e-5
_VMEM_LIMIT = 64 * 1024 * 1024   # raised scoped-VMEM cap (default ~32 MiB on v6e/v7x)


# ---------------------------------------------------------------------------
# Small helpers
# ---------------------------------------------------------------------------
def _round_up(x, m):
    return ((x + m - 1) // m) * m


def _choose_row_tile(m_rows, preferred=256):
    """Row tile: multiple of 8 (f32 sublane) and >= 2 grid steps when possible so
    BlockSpec auto-pipelining overlaps DMA with compute and both v7x TCs get work."""
    if m_rows >= 2 * preferred:
        return preferred
    half = -(-m_rows // 2)                       # ceil(m/2)
    return max(8, min(preferred, _round_up(half, 8)))


_SINGLE_BUFFER_OK = None


def _probe_single_buffer():
    """pl.Buffered(1) single-buffers grid-invariant operands (weights). Probe once
    on a tiny kernel and fall back to default double-buffering if rejected."""
    global _SINGLE_BUFFER_OK
    if _SINGLE_BUFFER_OK is not None:
        return _SINGLE_BUFFER_OK
    try:
        def _probe(x_ref, o_ref):
            o_ref[...] = x_ref[...] + 1.0

        out = pl.pallas_call(
            _probe,
            out_shape=jax.ShapeDtypeStruct((8, 128), jnp.float32),
            grid_spec=pltpu.PrefetchScalarGridSpec(
                num_scalar_prefetch=0,
                grid=(2,),
                in_specs=[pl.BlockSpec((8, 128), lambda i: (0, 0),
                                       pipeline_mode=pl.Buffered(1))],
                out_specs=pl.BlockSpec((8, 128), lambda i: (0, 0)),
            ),
        )(jnp.zeros((8, 128), jnp.float32))
        jax.block_until_ready(out)
        _SINGLE_BUFFER_OK = True
    except Exception:
        _SINGLE_BUFFER_OK = False
    return _SINGLE_BUFFER_OK


def _resident_spec(block_shape, index_map):
    """BlockSpec for operands whose block never changes over the grid (weights,
    biases, LN params): keep a single VMEM copy instead of a double buffer."""
    if _probe_single_buffer():
        return pl.BlockSpec(block_shape, index_map, pipeline_mode=pl.Buffered(1))
    return pl.BlockSpec(block_shape, index_map)


def _split_sizes(t, sizes, axis):
    outs, start = [], 0
    for s in sizes:
        outs.append(jax.lax.slice_in_dim(t, start, start + s, axis=axis))
        start += s
    return outs


def _split_heads(t, num_heads):
    b, tt, c = t.shape
    return t.reshape(b, tt, num_heads, c // num_heads).transpose(0, 2, 1, 3)


def _z_group(zg, h_g):
    b, m, hn = zg.shape
    return zg.reshape(b, m, h_g, hn // h_g).transpose(0, 2, 1, 3)


# ---------------------------------------------------------------------------
# Pallas kernels
# ---------------------------------------------------------------------------
def _ln_proj_kernel(x_ref, g_ref, b_ref, w_ref, o_ref):
    """out = LayerNorm(x) @ W (row-tile of tokens; W resident in VMEM)."""
    x = x_ref[...].astype(jnp.float32)
    mu = jnp.mean(x, axis=-1, keepdims=True)
    xc = x - mu
    var = jnp.mean(xc * xc, axis=-1, keepdims=True)
    xn = xc * jax.lax.rsqrt(var + _LN_EPS) * g_ref[...] + b_ref[...]
    # Feed the MXU in the weights' native dtype; accumulate in f32.
    o_ref[...] = jnp.dot(xn.astype(w_ref.dtype), w_ref[...],
                         preferred_element_type=jnp.float32).astype(o_ref.dtype)


def _add_ln_kernel(x_ref, y_ref, g_ref, b_ref, sum_ref, ln_ref):
    """sum = x + y ; ln = LayerNorm(sum)  (fused residual-add + norm2)."""
    s = x_ref[...].astype(jnp.float32) + y_ref[...].astype(jnp.float32)
    mu = jnp.mean(s, axis=-1, keepdims=True)
    sc = s - mu
    var = jnp.mean(sc * sc, axis=-1, keepdims=True)
    sum_ref[...] = s.astype(sum_ref.dtype)
    ln_ref[...] = (sc * jax.lax.rsqrt(var + _LN_EPS) * g_ref[...]
                   + b_ref[...]).astype(ln_ref.dtype)


def _cluster_attn_kernel(q_ref, k_ref, v_ref, z_ref, o_ref, *, scale):
    """One (batch, head) slice of the clustered attention.
        z    = softmax_over_tokens(z_logits)          (M, n)
        k_c  = z^T k ; v_c = z^T v                    (n, d)
        out  = softmax(q k_c^T * scale) v_c           (N, d)
    implemented with contract-last-dim dots only:
        q k_c^T = (q k^T) z     and     attn v_c = (attn z^T) v
    """
    q = q_ref[...][0].astype(jnp.float32)     # (N, d)
    k = k_ref[...][0].astype(jnp.float32)     # (M, d)
    v = v_ref[...][0].astype(jnp.float32)     # (M, d)
    zl = z_ref[...][0].astype(jnp.float32)    # (M, n)

    # softmax over the token axis (dim 0)
    z = jnp.exp(zl - jnp.max(zl, axis=0, keepdims=True))
    z = z / jnp.sum(z, axis=0, keepdims=True)

    qk = jax.lax.dot_general(q, k, (((1,), (1,)), ((), ())),
                             preferred_element_type=jnp.float32)        # (N, M)
    s = jnp.dot(qk, z, preferred_element_type=jnp.float32) * scale      # (N, n)
    p = jnp.exp(s - jnp.max(s, axis=-1, keepdims=True))
    p = p / jnp.sum(p, axis=-1, keepdims=True)
    pz = jax.lax.dot_general(p, z, (((1,), (1,)), ((), ())),
                             preferred_element_type=jnp.float32)        # (N, M)
    o = jnp.dot(pz, v, preferred_element_type=jnp.float32)              # (N, d)
    o_ref[...] = o.astype(o_ref.dtype)[None, :, :]


def _mlp_residual_kernel(res_ref, x_ref, w1_ref, b1_ref, w2_ref, b2_ref, o_ref):
    """out = res + GELU(BN(fc2(GELU(BN(fc1(x)))))) with the (eval-mode) BatchNorms
    folded into w1/b1 and w2/b2 by the wrapper. Operands feed the MXU in their
    native dtype (no f32 up-cast); accumulation is f32."""
    h = jnp.dot(x_ref[...], w1_ref[...],
                preferred_element_type=jnp.float32) + b1_ref[...]
    h = jax.nn.gelu(h, approximate=False)
    y = jnp.dot(h.astype(w2_ref.dtype), w2_ref[...],
                preferred_element_type=jnp.float32) + b2_ref[...]
    y = jax.nn.gelu(y, approximate=False)
    o_ref[...] = (res_ref[...].astype(jnp.float32) + y).astype(o_ref.dtype)


# ---------------------------------------------------------------------------
# Pallas wrappers (row-tiled, multi-step parallel grids, padded for ragged rows)
# ---------------------------------------------------------------------------
def ln_proj_pallas(x2, gamma, beta, w, *, row_tile=None):
    m, cin = x2.shape
    cout = w.shape[1]
    rt = _choose_row_tile(m) if row_tile is None else row_tile
    mp = _round_up(m, rt)
    xp = jnp.pad(x2, ((0, mp - m), (0, 0))) if mp != m else x2
    itemsize = jnp.dtype(x2.dtype).itemsize
    out = pl.pallas_call(
        _ln_proj_kernel,
        out_shape=jax.ShapeDtypeStruct((mp, cout), x2.dtype),
        grid_spec=pltpu.PrefetchScalarGridSpec(
            num_scalar_prefetch=0,
            grid=(mp // rt,),
            in_specs=[
                pl.BlockSpec((rt, cin), lambda i: (i, 0)),
                _resident_spec((1, cin), lambda i: (0, 0)),
                _resident_spec((1, cin), lambda i: (0, 0)),
                _resident_spec((cin, cout), lambda i: (0, 0)),
            ],
            out_specs=pl.BlockSpec((rt, cout), lambda i: (i, 0)),
        ),
        compiler_params=pltpu.CompilerParams(
            dimension_semantics=("parallel",),
            vmem_limit_bytes=_VMEM_LIMIT),
        cost_estimate=pl.CostEstimate(
            flops=2 * mp * cin * cout,
            transcendentals=0,
            bytes_accessed=(mp * cin + cin * cout + mp * cout) * itemsize),
    )(xp,
      gamma.reshape(1, cin).astype(jnp.float32),
      beta.reshape(1, cin).astype(jnp.float32),
      w)
    return out[:m]


def add_ln_pallas(x2, y2, gamma, beta, *, row_tile=None):
    m, c = x2.shape
    rt = _choose_row_tile(m) if row_tile is None else row_tile
    mp = _round_up(m, rt)
    if mp != m:
        x2 = jnp.pad(x2, ((0, mp - m), (0, 0)))
        y2 = jnp.pad(y2, ((0, mp - m), (0, 0)))
    s, n = pl.pallas_call(
        _add_ln_kernel,
        out_shape=(jax.ShapeDtypeStruct((mp, c), x2.dtype),
                   jax.ShapeDtypeStruct((mp, c), x2.dtype)),
        grid_spec=pltpu.PrefetchScalarGridSpec(
            num_scalar_prefetch=0,
            grid=(mp // rt,),
            in_specs=[
                pl.BlockSpec((rt, c), lambda i: (i, 0)),
                pl.BlockSpec((rt, c), lambda i: (i, 0)),
                _resident_spec((1, c), lambda i: (0, 0)),
                _resident_spec((1, c), lambda i: (0, 0)),
            ],
            out_specs=[
                pl.BlockSpec((rt, c), lambda i: (i, 0)),
                pl.BlockSpec((rt, c), lambda i: (i, 0)),
            ],
        ),
        compiler_params=pltpu.CompilerParams(
            dimension_semantics=("parallel",),
            vmem_limit_bytes=_VMEM_LIMIT),
    )(x2, y2,
      gamma.reshape(1, c).astype(jnp.float32),
      beta.reshape(1, c).astype(jnp.float32))
    return s[:m], n[:m]


def cluster_attention_pallas(q, k, v, z_logits, scale):
    """q: (B,h,N,d); k,v: (B,h,M,d); z_logits: (B,h,M,n) -> (B,h,N,d)."""
    b, h, n_tok, d = q.shape
    m_tok = k.shape[2]
    n_buckets = z_logits.shape[3]
    bh = b * h
    out = pl.pallas_call(
        functools.partial(_cluster_attn_kernel, scale=scale),
        out_shape=jax.ShapeDtypeStruct((bh, n_tok, d), q.dtype),
        grid_spec=pltpu.PrefetchScalarGridSpec(
            num_scalar_prefetch=0,
            grid=(bh,),
            in_specs=[
                pl.BlockSpec((1, n_tok, d), lambda i: (i, 0, 0)),
                pl.BlockSpec((1, m_tok, d), lambda i: (i, 0, 0)),
                pl.BlockSpec((1, m_tok, d), lambda i: (i, 0, 0)),
                pl.BlockSpec((1, m_tok, n_buckets), lambda i: (i, 0, 0)),
            ],
            out_specs=pl.BlockSpec((1, n_tok, d), lambda i: (i, 0, 0)),
        ),
        compiler_params=pltpu.CompilerParams(
            dimension_semantics=("parallel",),
            vmem_limit_bytes=_VMEM_LIMIT),
    )(q.reshape(bh, n_tok, d), k.reshape(bh, m_tok, d),
      v.reshape(bh, m_tok, d), z_logits.reshape(bh, m_tok, n_buckets))
    return out.reshape(b, h, n_tok, d)


def mlp_residual_pallas(res2, x2, w1, b1, w2, b2, *, row_tile=None):
    m, c = x2.shape
    hidden = w1.shape[1]
    cout = w2.shape[1]
    rt = _choose_row_tile(m) if row_tile is None else row_tile
    mp = _round_up(m, rt)
    if mp != m:
        x2 = jnp.pad(x2, ((0, mp - m), (0, 0)))
        res2 = jnp.pad(res2, ((0, mp - m), (0, 0)))
    itemsize = jnp.dtype(x2.dtype).itemsize
    out = pl.pallas_call(
        _mlp_residual_kernel,
        out_shape=jax.ShapeDtypeStruct((mp, cout), x2.dtype),
        grid_spec=pltpu.PrefetchScalarGridSpec(
            num_scalar_prefetch=0,
            grid=(mp // rt,),
            in_specs=[
                pl.BlockSpec((rt, cout), lambda i: (i, 0)),    # residual rows
                pl.BlockSpec((rt, c), lambda i: (i, 0)),       # conv features
                _resident_spec((c, hidden), lambda i: (0, 0)),
                _resident_spec((1, hidden), lambda i: (0, 0)),
                _resident_spec((hidden, cout), lambda i: (0, 0)),
                _resident_spec((1, cout), lambda i: (0, 0)),
            ],
            out_specs=pl.BlockSpec((rt, cout), lambda i: (i, 0)),
        ),
        compiler_params=pltpu.CompilerParams(
            dimension_semantics=("parallel",),
            vmem_limit_bytes=_VMEM_LIMIT),
        cost_estimate=pl.CostEstimate(
            flops=2 * mp * (c * hidden + hidden * cout),
            transcendentals=mp * (hidden + cout),
            bytes_accessed=(2 * mp * c + c * hidden + hidden * cout
                            + mp * cout) * itemsize),
    )(res2, x2, w1, b1.reshape(1, hidden), w2, b2.reshape(1, cout))
    return out[:m]


# ---------------------------------------------------------------------------
# Non-Pallas pieces (depthwise convs) and BN folding
# ---------------------------------------------------------------------------
def _dwconv_bn_gelu(x_nchw, w, b, bn, k):
    """Depthwise kxk conv (zero 'same' pad) + eval-mode BatchNorm + GELU."""
    # TODO(synk): spatial depthwise 3/5/7 convs are left to XLA (lax.conv); no clean
    # rectangular-tile Pallas formulation for the halo exchange at these tiny sizes.
    c = x_nchw.shape[1]
    out = jax.lax.conv_general_dilated(
        x_nchw, w, window_strides=(1, 1),
        padding=((k // 2, k // 2), (k // 2, k // 2)),
        dimension_numbers=("NCHW", "OIHW", "NCHW"),
        feature_group_count=c)
    out = out + b[None, :, None, None]
    scale = bn["gamma"] / jnp.sqrt(bn["var"] + _BN_EPS)
    shift = bn["beta"] - bn["mean"] * scale
    out = out * scale[None, :, None, None] + shift[None, :, None, None]
    return jax.nn.gelu(out, approximate=False)


def _fold_conv1x1_bn(w_io, b, bn):
    """Fold eval-mode BatchNorm into a 1x1 conv stored as (in, out)."""
    scale = bn["gamma"] / jnp.sqrt(bn["var"] + _BN_EPS)
    shift = bn["beta"] - bn["mean"] * scale
    return w_io * scale[None, :], b * scale + shift


# ---------------------------------------------------------------------------
# Full newdeBlock forward (Pallas-backed)
# ---------------------------------------------------------------------------
def newde_block_forward(params, x, dx):
    b, n_tok, c = x.shape
    hs = ws = int(math.sqrt(n_tok))
    num_heads = params["num_heads"]
    head_dim = c // num_heads
    head_splits = params["head_splits"]
    bucket_list = params["bucket_list"]
    scale = params["scale"]
    m_tok = dx.shape[1]
    dedim = dx.shape[2]

    x_flat = x.reshape(b * n_tok, c)
    dx_flat = dx.reshape(b * m_tok, dedim)

    # projections (LayerNorm fused into the matmul kernels); kv and z share LN(dx).
    q_flat = ln_proj_pallas(x_flat, params["ln1_g"], params["ln1_b"], params["wq"])
    w_dx = jnp.concatenate([params["wkv"], params["wz"]], axis=1)
    dx_proj = ln_proj_pallas(dx_flat, params["ln1d_g"], params["ln1d_b"], w_dx)
    kv_flat = dx_proj[:, : 2 * c]
    z_flat = dx_proj[:, 2 * c:]

    q = _split_heads(q_flat.reshape(b, n_tok, c), num_heads)            # (B,H,N,d)
    k = _split_heads(kv_flat[:, :c].reshape(b, m_tok, c), num_heads)    # (B,H,M,d)
    v = _split_heads(kv_flat[:, c:].reshape(b, m_tok, c), num_heads)    # (B,H,M,d)

    z_all = z_flat.reshape(b, m_tok, -1)
    z_groups = _split_sizes(
        z_all, [h * nb for h, nb in zip(head_splits, bucket_list)], axis=2)
    q_groups = _split_sizes(q, head_splits, axis=1)
    k_groups = _split_sizes(k, head_splits, axis=1)
    v_groups = _split_sizes(v, head_splits, axis=1)

    outs = []
    for qg, kg, vg, zg, hg in zip(q_groups, k_groups, v_groups, z_groups, head_splits):
        zz = _z_group(zg, hg)                                   # (B,hg,M,nb)
        og = cluster_attention_pallas(qg, kg, vg, zz, scale)    # (B,hg,N,d)
        outs.append(og.transpose(0, 2, 1, 3).reshape(b, n_tok, hg * head_dim))
    attn_out = jnp.concatenate(outs, axis=2)                    # (B,N,C)
    # TODO(synk): self.crpe is an externally supplied module (None in this spec);
    # its conv relative-position term is not translated here.

    # residual add + norm2, fused
    x1_flat, x1_ln_flat = add_ln_pallas(
        x_flat, attn_out.reshape(b * n_tok, c), params["ln2_g"], params["ln2_b"])

    # DwMlp: depthwise convs (XLA) + BN-folded fc1/fc2 fused MLP with residual (Pallas)
    feat = x1_ln_flat.reshape(b, n_tok, c).transpose(0, 2, 1).reshape(b, c, hs, ws)
    splits = _split_sizes(feat, params["dw_channel_splits"], axis=1)
    conv_outs = [
        _dwconv_bn_gelu(s, params["dw_w"][i], params["dw_b"][i],
                        params["dw_bn"][i], params["dw_kernels"][i])
        for i, s in enumerate(splits)
    ]
    conv_cat = jnp.concatenate(conv_outs, axis=1)
    conv_tokens = conv_cat.reshape(b, c, n_tok).transpose(0, 2, 1).reshape(b * n_tok, c)

    w1f, b1f = _fold_conv1x1_bn(params["fc1_w"], params["fc1_b"], params["fc1_bn"])
    w2f, b2f = _fold_conv1x1_bn(params["fc2_w"], params["fc2_b"], params["fc2_bn"])
    x2_flat = mlp_residual_pallas(x1_flat, conv_tokens, w1f, b1f, w2f, b2f)

    return x2_flat.reshape(b, n_tok, c), dx


# ---------------------------------------------------------------------------
# Pure-JAX reference (mirrors the PyTorch ops) for correctness checking
# ---------------------------------------------------------------------------
def _layernorm_ref(x, g, bb):
    mu = jnp.mean(x, axis=-1, keepdims=True)
    var = jnp.mean(jnp.square(x - mu), axis=-1, keepdims=True)
    return (x - mu) / jnp.sqrt(var + _LN_EPS) * g + bb


def newde_block_reference(params, x, dx):
    b, n_tok, c = x.shape
    hs = ws = int(math.sqrt(n_tok))
    num_heads = params["num_heads"]
    head_dim = c // num_heads
    head_splits = params["head_splits"]
    bucket_list = params["bucket_list"]
    scale = params["scale"]
    m_tok = dx.shape[1]

    x_ = _layernorm_ref(x, params["ln1_g"], params["ln1_b"])
    dx_ = _layernorm_ref(dx, params["ln1d_g"], params["ln1d_b"])

    kv = (dx_ @ params["wkv"]).reshape(b, m_tok, 2, num_heads, head_dim)
    kv = kv.transpose(2, 0, 3, 1, 4)
    k, v = kv[0], kv[1]
    q = (x_ @ params["wq"]).reshape(b, n_tok, num_heads, head_dim).transpose(0, 2, 1, 3)

    z = dx_ @ params["wz"]
    z_groups = _split_sizes(
        z, [h * nb for h, nb in zip(head_splits, bucket_list)], axis=2)
    z_list = [jax.nn.softmax(_z_group(zg, hg), axis=2)
              for zg, hg in zip(z_groups, head_splits)]
    q_list = _split_sizes(q, head_splits, axis=1)
    k_list = _split_sizes(k, head_splits, axis=1)
    v_list = _split_sizes(v, head_splits, axis=1)
    k_list = [jnp.einsum("bhNd,bhNn->bhnd", kk, zz) for kk, zz in zip(k_list, z_list)]
    v_list = [jnp.einsum("bhNd,bhNn->bhnd", vv, zz) for vv, zz in zip(v_list, z_list)]
    attn_list = [jax.nn.softmax(jnp.einsum("bhNd,bhnd->bhNn", qq, kk * scale), axis=-1)
                 for qq, kk in zip(q_list, k_list)]
    x_list = [jnp.einsum("bhNn,bhnd->bhNd", aa, vv).transpose(0, 2, 1, 3)
              .reshape(b, n_tok, -1) for aa, vv in zip(attn_list, v_list)]
    x1 = x + jnp.concatenate(x_list, axis=2)   # crpe omitted (see TODO above)

    x1_ln = _layernorm_ref(x1, params["ln2_g"], params["ln2_b"])
    feat = x1_ln.transpose(0, 2, 1).reshape(b, c, hs, ws)
    splits = _split_sizes(feat, params["dw_channel_splits"], axis=1)
    conv_outs = [
        _dwconv_bn_gelu(s, params["dw_w"][i], params["dw_b"][i],
                        params["dw_bn"][i], params["dw_kernels"][i])
        for i, s in enumerate(splits)
    ]
    conv_cat = jnp.concatenate(conv_outs, axis=1)

    def conv1x1_bn_gelu(t_nchw, w_io, bias, bn):
        u = jnp.einsum("bchw,cd->bdhw", t_nchw, w_io) + bias[None, :, None, None]
        s_ = bn["gamma"] / jnp.sqrt(bn["var"] + _BN_EPS)
        t_ = bn["beta"] - bn["mean"] * s_
        u = u * s_[None, :, None, None] + t_[None, :, None, None]
        return jax.nn.gelu(u, approximate=False)

    h1 = conv1x1_bn_gelu(conv_cat, params["fc1_w"], params["fc1_b"], params["fc1_bn"])
    h2 = conv1x1_bn_gelu(h1, params["fc2_w"], params["fc2_b"], params["fc2_bn"])
    mlp_out = h2.reshape(b, c, n_tok).transpose(0, 2, 1)
    return x1 + mlp_out, dx


# ---------------------------------------------------------------------------
# Deterministic parameter init (PyTorch-default-like)
# ---------------------------------------------------------------------------
def init_newde_params(key, dim, dedim, *, num_heads=8, n_buckets=8, dtype=jnp.float32):
    head_dim = dim // num_heads
    hidden = 4 * dim
    bucket_list = [n_buckets * 2, n_buckets, n_buckets // 2]
    head_splits = [2, 3, 3]
    z_out = sum(h * nb for h, nb in zip(head_splits, bucket_list))
    dw_kernels = [3, 5, 7]
    dw_channel_splits = [h * head_dim for h in [2, 3, 3]]   # window = {3:2, 5:3, 7:3}

    kit = iter(jax.random.split(key, 64))

    def unif(shape, bound):
        return jax.random.uniform(next(kit), shape, dtype, -bound, bound)

    def ln_pair(nfeat):
        return (1.0 + 0.1 * jax.random.normal(next(kit), (nfeat,), dtype),
                0.1 * jax.random.normal(next(kit), (nfeat,), dtype))

    def bn_params(nfeat):
        return {
            "gamma": 1.0 + 0.1 * jax.random.normal(next(kit), (nfeat,), dtype),
            "beta": 0.1 * jax.random.normal(next(kit), (nfeat,), dtype),
            "mean": 0.1 * jax.random.normal(next(kit), (nfeat,), dtype),
            "var": 1.0 + 0.1 * jax.random.uniform(next(kit), (nfeat,), dtype),
        }

    p = {
        "num_heads": num_heads,
        "head_splits": head_splits,
        "bucket_list": bucket_list,
        "scale": float(head_dim ** (-0.5)),
        "dw_kernels": dw_kernels,
        "dw_channel_splits": dw_channel_splits,
    }
    p["ln1_g"], p["ln1_b"] = ln_pair(dim)
    p["ln1d_g"], p["ln1d_b"] = ln_pair(dedim)
    p["ln2_g"], p["ln2_b"] = ln_pair(dim)
    # linear weights stored as (in, out) == PyTorch weight.T; qkv_bias=False
    p["wq"] = unif((dim, dim), 1.0 / math.sqrt(dim))
    p["wkv"] = unif((dedim, 2 * dim), 1.0 / math.sqrt(dedim))
    p["wz"] = unif((dedim, z_out), 1.0 / math.sqrt(dedim))
    p["dw_w"], p["dw_b"], p["dw_bn"] = [], [], []
    for kk, ch in zip(dw_kernels, dw_channel_splits):
        bound = 1.0 / math.sqrt(kk * kk)
        p["dw_w"].append(unif((ch, 1, kk, kk), bound))
        p["dw_b"].append(unif((ch,), bound))
        p["dw_bn"].append(bn_params(ch))
    p["fc1_w"] = unif((dim, hidden), 1.0 / math.sqrt(dim))
    p["fc1_b"] = unif((hidden,), 1.0 / math.sqrt(dim))
    p["fc1_bn"] = bn_params(hidden)
    p["fc2_w"] = unif((hidden, dim), 1.0 / math.sqrt(hidden))
    p["fc2_b"] = unif((dim,), 1.0 / math.sqrt(hidden))
    p["fc2_bn"] = bn_params(dim)
    return p


if __name__ == "__main__":
    B = 2
    num_heads = 8
    dim = 64            # C (multiple of num_heads); head_dim = 8
    dedim = 32
    n_buckets = 8
    N = 64              # tokens -> 8x8 feature map; dx has N // 4 tokens

    key = jax.random.PRNGKey(0)
    kx, kdx, kp = jax.random.split(key, 3)
    x = jax.random.normal(kx, (B, N, dim), jnp.float32)
    dx = jax.random.normal(kdx, (B, N // 4, dedim), jnp.float32)
    params = init_newde_params(kp, dim, dedim, num_heads=num_heads, n_buckets=n_buckets)

    y, dy = newde_block_forward(params, x, dx)
    y = jax.block_until_ready(y)

    y_ref, _ = newde_block_reference(params, x, dx)
    err = float(jnp.max(jnp.abs(y - y_ref)))
    assert err < 1e-3, f"Pallas forward mismatch vs JAX reference: max|diff|={err}"
    assert y.shape == (B, N, dim) and dy.shape == dx.shape

    print("KERNEL_OK")
</pallas_src>

<mosaic_0001>
module attributes {stable_mosaic.version = 11 : i64} {
  func.func @_probe(%arg0: i32, %arg1: memref<8x128xf32, #tpu.memory_space<vmem>>, %arg2: memref<8x128xf32, #tpu.memory_space<vmem>>) attributes {dimension_semantics = [#tpu.dimension_semantics<arbitrary>], iteration_bounds = array<i64: 2>, scalar_prefetch = 0 : i64, scratch_operands = 0 : i64, tpu.core_type = #tpu.core_type<tc>, window_params = [{pipeline_mode = #tpu.pipeline_mode<synchronous>, transform_indices = @transform_0, window_bounds = array<i64: 8, 128>}, {pipeline_mode = #tpu.pipeline_mode<synchronous>, transform_indices = @transform_1, window_bounds = array<i64: 8, 128>}]} {
    %c0 = arith.constant 0 : index
    %c0_0 = arith.constant 0 : index
    %0 = vector.load %arg1[%c0, %c0_0] : memref<8x128xf32, #tpu.memory_space<vmem>>, vector<8x128xf32>
    %cst = arith.constant 1.000000e+00 : f32
    %1 = vector.broadcast %cst : f32 to vector<8x128xf32>
    %2 = arith.addf %0, %1 : vector<8x128xf32>
    %c0_1 = arith.constant 0 : index
    %c0_2 = arith.constant 0 : index
    %3 = vector.load %arg2[%c0_1, %c0_2] : memref<8x128xf32, #tpu.memory_space<vmem>>, vector<8x128xf32>
    tpu.vector_store %arg2[%c0_1, %c0_2], %2 {strides = array<i32>} : memref<8x128xf32, #tpu.memory_space<vmem>>, vector<8x128xf32>,
    return
  }
  func.func @transform_0(%arg0: i32) -> (i32, i32) {
    %c0_i32 = arith.constant 0 : i32
    %c0_i32_0 = arith.constant 0 : i32
    %c0_i32_1 = arith.constant 0 : i32
    return %c0_i32, %c0_i32_0 : i32, i32
  }
  func.func @transform_1(%arg0: i32) -> (i32, i32) {
    %c0_i32 = arith.constant 0 : i32
    %c0_i32_0 = arith.constant 0 : i32
    %c0_i32_1 = arith.constant 0 : i32
    return %c0_i32, %c0_i32_0 : i32, i32
  }
}

module attributes {stable_mosaic.version = 11 : i64} {
  func.func @_ln_proj_kernel(%arg0: i32, %arg1: memref<64x64xf32, #tpu.memory_space<vmem>>, %arg2: memref<1x64xf32, #tpu.memory_space<vmem>>, %arg3: memref<1x64xf32, #tpu.memory_space<vmem>>, %arg4: memref<64x64xf32, #tpu.memory_space<vmem>>, %arg5: memref<64x64xf32, #tpu.memory_space<vmem>>) attributes {dimension_semantics = [#tpu.dimension_semantics<parallel>], iteration_bounds = array<i64: 2>, scalar_prefetch = 0 : i64, scratch_operands = 0 : i64, tpu.core_type = #tpu.core_type<tc>, window_params = [{transform_indices = @transform_0, window_bounds = array<i64: 64, 64>}, {pipeline_mode = #tpu.pipeline_mode<synchronous>, transform_indices = @transform_1, window_bounds = array<i64: 1, 64>}, {pipeline_mode = #tpu.pipeline_mode<synchronous>, transform_indices = @transform_2, window_bounds = array<i64: 1, 64>}, {pipeline_mode = #tpu.pipeline_mode<synchronous>, transform_indices = @transform_3, window_bounds = array<i64: 64, 64>}, {transform_indices = @transform_4, window_bounds = array<i64: 64, 64>}]} {
    %c0 = arith.constant 0 : index
    %c0_0 = arith.constant 0 : index
    %0 = vector.load %arg1[%c0, %c0_0] : memref<64x64xf32, #tpu.memory_space<vmem>>, vector<64x64xf32>
    %cst = arith.constant dense<0.000000e+00> : vector<64xf32>
    %1 = vector.multi_reduction <add>, %0, %cst [1] : vector<64x64xf32> to vector<64xf32>
    %2 = vector.shape_cast %1 : vector<64xf32> to vector<64x1xf32>
    %cst_1 = arith.constant 6.400000e+01 : f32
    %3 = vector.broadcast %cst_1 : f32 to vector<64x1xf32>
    %4 = arith.divf %2, %3 : vector<64x1xf32>
    %5 = vector.broadcast %4 : vector<64x1xf32> to vector<64x64xf32>
    %6 = arith.subf %0, %5 : vector<64x64xf32>
    %7 = arith.mulf %6, %6 : vector<64x64xf32>
    %cst_2 = arith.constant dense<0.000000e+00> : vector<64xf32>
    %8 = vector.multi_reduction <add>, %7, %cst_2 [1] : vector<64x64xf32> to vector<64xf32>
    %9 = vector.shape_cast %8 : vector<64xf32> to vector<64x1xf32>
    %cst_3 = arith.constant 6.400000e+01 : f32
    %10 = vector.broadcast %cst_3 : f32 to vector<64x1xf32>
    %11 = arith.divf %9, %10 : vector<64x1xf32>
    %cst_4 = arith.constant 9.99999974E-6 : f32
    %12 = vector.broadcast %cst_4 : f32 to vector<64x1xf32>
    %13 = arith.addf %11, %12 : vector<64x1xf32>
    %14 = math.rsqrt %13 : vector<64x1xf32>
    %15 = vector.broadcast %14 : vector<64x1xf32> to vector<64x64xf32>
    %16 = arith.mulf %6, %15 : vector<64x64xf32>
    %c0_5 = arith.constant 0 : index
    %c0_6 = arith.constant 0 : index
    %17 = vector.load %arg2[%c0_5, %c0_6] : memref<1x64xf32, #tpu.memory_space<vmem>>, vector<1x64xf32>
    %18 = vector.broadcast %17 : vector<1x64xf32> to vector<64x64xf32>
    %19 = arith.mulf %16, %18 : vector<64x64xf32>
    %c0_7 = arith.constant 0 : index
    %c0_8 = arith.constant 0 : index
    %20 = vector.load %arg3[%c0_7, %c0_8] : memref<1x64xf32, #tpu.memory_space<vmem>>, vector<1x64xf32>
    %21 = vector.broadcast %20 : vector<1x64xf32> to vector<64x64xf32>
    %22 = arith.addf %19, %21 : vector<64x64xf32>
    %c0_9 = arith.constant 0 : index
    %c0_10 = arith.constant 0 : index
    %23 = vector.load %arg4[%c0_9, %c0_10] : memref<64x64xf32, #tpu.memory_space<vmem>>, vector<64x64xf32>
    %cst_11 = arith.constant dense<0.000000e+00> : vector<64x64xf32>
    %24 = tpu.matmul %22, %23, %cst_11 {dimension_numbers = #tpu.dot_dimension_numbers<[1], [0], [0], [1], [0, 0, 1, 1], [], []>} : vector<64x64xf32>, vector<64x64xf32>, vector<64x64xf32> -> vector<64x64xf32>
    %c0_12 = arith.constant 0 : index
    %c0_13 = arith.constant 0 : index
    %25 = vector.load %arg5[%c0_12, %c0_13] : memref<64x64xf32, #tpu.memory_space<vmem>>, vector<64x64xf32>
    tpu.vector_store %arg5[%c0_12, %c0_13], %24 {strides = array<i32>} : memref<64x64xf32, #tpu.memory_space<vmem>>, vector<64x64xf32>,
    return
  }
  func.func @transform_0(%arg0: i32) -> (i32, i32) {
    %c0_i32 = arith.constant 0 : i32
    %c0_i32_0 = arith.constant 0 : i32
    return %arg0, %c0_i32 : i32, i32
  }
  func.func @transform_1(%arg0: i32) -> (i32, i32) {
    %c0_i32 = arith.constant 0 : i32
    %c0_i32_0 = arith.constant 0 : i32
    %c0_i32_1 = arith.constant 0 : i32
    return %c0_i32, %c0_i32_0 : i32, i32
  }
  func.func @transform_2(%arg0: i32) -> (i32, i32) {
    %c0_i32 = arith.constant 0 : i32
    %c0_i32_0 = arith.constant 0 : i32
    %c0_i32_1 = arith.constant 0 : i32
    return %c0_i32, %c0_i32_0 : i32, i32
  }
  func.func @transform_3(%arg0: i32) -> (i32, i32) {
    %c0_i32 = arith.constant 0 : i32
    %c0_i32_0 = arith.constant 0 : i32
    %c0_i32_1 = arith.constant 0 : i32
    return %c0_i32, %c0_i32_0 : i32, i32
  }
  func.func @transform_4(%arg0: i32) -> (i32, i32) {
    %c0_i32 = arith.constant 0 : i32
    %c0_i32_0 = arith.constant 0 : i32
    return %arg0, %c0_i32 : i32, i32
  }
}

</mosaic_0001>

<bundles_post_ra>
// kernel: tpu_custom_call.1
= control target key start
LH: loop header
LB: loop body
LE: loop exit
PB: predicated region body
PF: predicated region fallthrough
CT: control target
= control target key end

     0   :  { %6 = vsyncpa [#allocation3], 0  ;;  %s341_s0 = inlined_call_operand.hbm [shape: f32[8,128], index: 0, kind: input, shape index: {}]   ;;  %s342_s1 = inlined_call_operand.hbm [shape: f32[8,128], index: 1, kind: output, shape index: {}]  }
   0x1   :  { %7 = vsyncpa [#allocation4], 0  ;;  %s262_s6 = smov 0  }
   0x2 LB: > { %s145_s7 = sadd.s32 4294967295, %s248_s6   ;;  %p146_p0 = scmp.ge.s32.totalorder %s248_s6, 1  ;;  %s248_s6 = sphi %s262_s6, %s13_s6  }
   0x3   : > { %p60_p1 = scmp.lt.s32.totalorder %s248_s6, 3  ;;  %p276_p3 = scmp.eq.s32.totalorder %s145_s7, 0 }
   0x4   : > { %s250_s10 = smov [#allocation2]   ;;  %s180_s15 = scalar_lea.hbm %s341_s0, 128 }
   0x5   : > { %p270_p2 = pnand %p146_p0, %p60_p1  ;;  %s73_s11 = sshll.u32 %s250_s10, 4  ;;  %s74_s11 = int_to_ptr.vmem [resolvable:$true] %s73_s11 }
   0x6   : > { %s347_s9 = scalar_select %p276_p3, 1, 0 }
   0x7   : > { %s346_s8 = scalar_select %p270_p2, 1, 0 }
   0x8   : > { %p162_p4 = pneg %p270_p2  ;;  %p181_p6 = scmp.ne.s32.totalorder %s341_s0, %s180_s15 }
   0x9   : > { %p187_p10 = scmp.lt.u32.totalorder %s180_s15, %s341_s0 }
   0xa   : > { %p284_p5 = pnand %p276_p3, %p162_p4 }
   0xc   : > { %p182_p7 = pneg %p284_p5 }
   0xe   : > { %p183_p8 = pnand %p182_p7, %p181_p6 }
  0x10   : > { %p184_p9 = pneg %p183_p8 }
  0x12   : > { %p189_p11 = pnand %p187_p10, %p184_p9 }
  0x14   : > { %192 = shalt.err (!%p189_p11)
}
  0x15   : > { %s193_s20 = scalar_lea.vmem %s74_s11, 128  ;;  %p201_p1 = scmp.lt.s32.totalorder %s74_s11, %s74_s11 }
  0x16   : > { %p194_p12 = scmp.ne.s32.totalorder %s74_s11, %s193_s20  ;;  %p202_p4 = scmp.lt.s32.totalorder %s193_s20, %s193_s20 }
  0x18   : > { %p196_p13 = pnand %p194_p12, %p182_p7  ;;  %p203_p3 = por %p202_p4, %p201_p1 }
  0x1a   : > { %p197_p0 = pneg %p196_p13 }
  0x1c   : > { %p204_p2 = pnand %p203_p3, %p197_p0 }
  0x1e   : > { %207 = shalt.err (!%p204_p2)
}
  0x1f   : > { %165 = dma.hbm_to_vmem [thread:$0]  (!%p284_p5), %s341_s0, 128, %s74_s11, [#allocation3]  }
  0x20   : > { %p349_p6 = scmp.ne.s32.totalorder %s346_s8, 0 }
  0x21   : > { %p350_p8 = scmp.ne.s32.totalorder (!%p349_p6), %s347_s9, 0 }
  0x22   : > { %86 = sbr.rel (%p349_p6) target bundleno = 67 (0x43), region = 24 }
  0x29   : > { %239 = dma.done.wait (%p350_p8), [#allocation3], 128  }
  0x2a   : > { %241 = vsyncadd (%p350_p8), [#allocation3], 4294967168  ;;  %s251_s23 = smov [#allocation5]   ;;  %v96_v0 = vld [vmem:[#allocation2] sm:$0xff]  ;;  %p312_p2 = scmp.eq.s32.totalorder %s145_s7, 1 }
  0x2b   : > { %s106_s24 = sshll.u32 %s251_s23, 4  ;;  %v97_v1 = vadd.f32 1.0, %v96_v0  ;;  %s107_s24 = int_to_ptr.vmem [resolvable:$true] %s106_s24 }
  0x2c   : > { %s208_s26 = scalar_lea.vmem %s107_s24, 128  ;;  %p215_p9 = scmp.lt.s32.totalorder %s107_s24, %s107_s24 }
  0x2d   : > { %98 = vst [vmem:[#allocation5] sm:$0xff] %v97_v1  ;;  %p209_p3 = scmp.ne.s32.totalorder %s107_s24, %s208_s26  ;;  %p216_p10 = scmp.lt.s32.totalorder %s208_s26, %s208_s26 }
  0x2f   : > { %p210_p5 = pnand %p209_p3, %p312_p2  ;;  %p217_p11 = por %p216_p10, %p215_p9 }
  0x31   : > { %p211_p7 = pneg %p210_p5 }
  0x33   : > { %p218_p12 = pnand %p217_p11, %p211_p7 }
  0x35   : > { %221 = shalt.err (!%p218_p12)
}
  0x36   : > { %s222_s29 = scalar_lea.hbm %s342_s1, 128 }
  0x37   : > { %p223_p13 = scmp.ne.s32.totalorder %s342_s1, %s222_s29  ;;  %p228_p4 = scmp.lt.u32.totalorder %s222_s29, %s342_s1 }
  0x39   : > { %p224_p0 = pnand %p223_p13, %p312_p2 }
  0x3b   : > { %p225_p1 = pneg %p224_p0 }
  0x3d   : > { %p230_p6 = pnand %p228_p4, %p225_p1 }
  0x3f   : > { %233 = shalt.err (!%p230_p6)
}
  0x40   : > { %159 = dma.vmem_to_hbm [thread:$0]  (%p312_p2), %s107_s24, 128, %s342_s1, [#allocation4]  }
  0x41   : > { %243 = dma.done.wait (%p312_p2), [#allocation4], 128  }
  0x42   : > { %245 = vsyncadd (%p312_p2), [#allocation4], 4294967168 }
  0x43 PF: > { %s13_s6 = sadd.s32 1, %s248_s6  }
  0x44   : > { %p10_p8 = scmp.ge.s32.totalorder %s13_s6, 4  }
  0x46   :  { %12 = sbr.rel (!%p10_p8) target bundleno = 2 (0x2), region = 53 }
  0x4d   :  { %119 = vsyncpa [#allocation3], 1 }
  0x4e   :  { %121 = vsyncpa [#allocation3 + $0x1], 1 }
  0x4f   :  { %122 = vsyncpa [#allocation4], 1 }
  0x50   :  { %124 = vsyncpa [#allocation4 + $0x1], 1 }

// kernel: tpu_custom_call.1
= control target key start
LH: loop header
LB: loop body
LE: loop exit
PB: predicated region body
PF: predicated region fallthrough
CT: control target
= control target key end

     0   :  { %9 = vsyncpa [#allocation3], 0  ;;  %s1423_s0 = inlined_call_operand.hbm [shape: f32[128,64], index: 0, kind: input, shape index: {}]   ;;  %s1424_s1 = inlined_call_operand.hbm [shape: f32[1,64], index: 1, kind: input, shape index: {}]   ;;  %s1425_s2 = inlined_call_operand.hbm [shape: f32[1,64], index: 2, kind: input, shape index: {}]   ;;  %s1426_s3 = inlined_call_operand.hbm [shape: f32[64,64], index: 3, kind: input, shape index: {}]   ;;  %s1427_s4 = inlined_call_operand.hbm [shape: f32[128,64], index: 4, kind: output, shape index: {}]  }
   0x1   :  { %11 = vsyncpa [#allocation3 + $0x1], 0 }
   0x2   :  { %12 = vsyncpa [#allocation6], 0 }
   0x3   :  { %13 = vsyncpa [#allocation9], 0 }
   0x4   :  { %14 = vsyncpa [#allocation4], 0 }
   0x5   :  { %16 = vsyncpa [#allocation4 + $0x1], 0  ;;  %s1084_s15 = smov 0   ;;  %s1086_s16 = smov 0  }
   0x6   :  { %s1088_s17 = smov 0   ;;  %s1090_s18 = smov 0  }
   0x7 LB: > { %s1105_s19 = sadd.s32 4294967295, %s1048_s18   ;;  %s663_s20 = sadd.s32 4294967294, %s1048_s18   ;;  %s1048_s18 = sphi %s1090_s18, %s1450_s18   ;;  %s1044_s17 = sphi %s1088_s17, %s1449_s17   ;;  %s1040_s16 = sphi %s1086_s16, %s1448_s16   ;;  %s1036_s15 = sphi %s1084_s15, %s1447_s15  }
   0x8   : > { %p42_p0 = scmp.ne.s32.totalorder %s1040_s16, %s1036_s15  ;;  %p1428_p1 = scmp.eq.s32.totalorder %s1105_s19, 0 }
   0x9   : > { %p135_p3 = scmp.eq.s32.totalorder %s663_s20, 1  ;;  %p664_p5 = scmp.ge.s32.totalorder %s1048_s18, 1 }
   0xa   : > { %p1114_p4 = por %p1428_p1, %p42_p0  ;;  %p142_p7 = scmp.lt.s32.totalorder %s1048_s18, 3 }
   0xb   : > { %p1119_p6 = por %p135_p3, %p42_p0  ;;  %s1050_s24 = smov [#allocation5]  }
   0xc   : > { %s1431_s21 = scalar_select %p1114_p4, 1, 0 }
   0xd   : > { %s1432_s22 = scalar_select %p1119_p6, 1, 0 }
   0xe   : > { %p1124_p8 = pnand %p664_p5, %p142_p7  ;;  %s155_s25 = sshll.u32 %s1050_s24, 4  ;;  %s156_s25 = int_to_ptr.vmem [resolvable:$true] %s155_s25 }
   0xf   : > { %s1051_s26 = smov [#allocation7]   ;;  %s1052_s29 = smov [#allocation8]  }
  0x10   : > { %s1433_s23 = scalar_select %p1124_p8, 1, 0 }
  0x11   : > { %p779_p10 = pneg %p1124_p8  ;;  %s166_s27 = sshll.u32 %s1051_s26, 4  ;;  %s1137_s27 = int_to_ptr.vmem [resolvable:$true] %s166_s27 }
  0x12   : > { %s176_s30 = sshll.u32 %s1052_s29, 4  ;;  %s860_s7 = scalar_lea.hbm %s1424_s1, 16  ;;  %s1139_s30 = int_to_ptr.vmem [resolvable:$true] %s176_s30 }
  0x13   : > { %p1133_p11 = pnand %p779_p10, %p1428_p1  ;;  %p861_p12 = scmp.ne.s32.totalorder %s1424_s1, %s860_s7 }
  0x14   : > { %p867_p5 = scmp.lt.u32.totalorder %s860_s7, %s1424_s1 }
  0x15   : > { %p1149_p13 = pneg %p1133_p11 }
  0x17   : > { %p863_p0 = pnand %p1149_p13, %p861_p12 }
  0x19   : > { %p864_p3 = pneg %p863_p0 }
  0x1b   : > { %p869_p7 = pnand %p867_p5, %p864_p3 }
  0x1d   : > { %872 = shalt.err (!%p869_p7)
}
  0x1e   : > { %s873_s13 = scalar_lea.vmem %s156_s25, 16  ;;  %s880_s14 = scalar_lea.vmem %s156_s25, 32 }
  0x1f   : > { %p874_p10 = scmp.ne.s32.totalorder %s156_s25, %s873_s13  ;;  %p881_p2 = scmp.lt.s32.totalorder %s156_s25, %s156_s25 }
  0x20   : > { %p882_p6 = scmp.lt.s32.totalorder %s880_s14, %s873_s13 }
  0x21   : > { %p876_p9 = pnand %p874_p10, %p1149_p13 }
  0x22   : > { %p883_p4 = por %p882_p6, %p881_p2 }
  0x23   : > { %p877_p1 = pneg %p876_p9 }
  0x25   : > { %p884_p8 = pnand %p883_p4, %p877_p1 }
  0x27   : > { %887 = shalt.err (!%p884_p8)
}
  0x28   : > { %782 = dma.hbm_to_vmem [thread:$0]  (!%p1133_p11), %s1424_s1, 16, %s156_s25, [#allocation6]  }
  0x29   : > { %s888_s5 = scalar_lea.hbm %s1425_s2, 16 }
  0x2a   : > { %p889_p9 = scmp.ne.s32.totalorder %s1425_s2, %s888_s5  ;;  %p895_p1 = scmp.lt.u32.totalorder %s888_s5, %s1425_s2 }
  0x2c   : > { %p891_p12 = pnand %p889_p9, %p1149_p13 }
  0x2e   : > { %p892_p2 = pneg %p891_p12 }
  0x30   : > { %p897_p4 = pnand %p895_p1, %p892_p2 }
  0x32   : > { %900 = shalt.err (!%p897_p4)
}
  0x33   : > { %s901_s25 = scalar_lea.vmem %s1137_s27, 16  ;;  %s908_s11 = scalar_lea.vmem %s1137_s27, 32 }
  0x34   : > { %p902_p6 = scmp.ne.s32.totalorder %s1137_s27, %s901_s25  ;;  %p909_p3 = scmp.lt.s32.totalorder %s1137_s27, %s1137_s27 }
  0x35   : > { %p910_p5 = scmp.lt.s32.totalorder %s908_s11, %s901_s25 }
  0x36   : > { %p904_p8 = pnand %p902_p6, %p1149_p13 }
  0x37   : > { %p911_p7 = por %p910_p5, %p909_p3 }
  0x38   : > { %p905_p0 = pneg %p904_p8 }
  0x3a   : > { %p912_p10 = pnand %p911_p7, %p905_p0 }
  0x3c   : > { %915 = shalt.err (!%p912_p10)
}
  0x3d   : > { %785 = dma.hbm_to_vmem [thread:$0]  (!%p1133_p11), %s1425_s2, 16, %s1137_s27, [#allocation6]  }
  0x3e   : > { %s916_s24 = scalar_lea.hbm %s1426_s3, 1024 }
  0x3f   : > { %p917_p9 = scmp.ne.s32.totalorder %s1426_s3, %s916_s24  ;;  %p923_p1 = scmp.lt.u32.totalorder %s916_s24, %s1426_s3 }
  0x41   : > { %p919_p12 = pnand %p917_p9, %p1149_p13 }
  0x43   : > { %p920_p2 = pneg %p919_p12 }
  0x45   : > { %p925_p4 = pnand %p923_p1, %p920_p2 }
  0x47   : > { %928 = shalt.err (!%p925_p4)
}
  0x48   : > { %s929_s27 = scalar_lea.vmem %s1139_s30, 1024  ;;  %p937_p3 = scmp.lt.s32.totalorder %s1139_s30, %s1139_s30 }
  0x49   : > { %p930_p6 = scmp.ne.s32.totalorder %s1139_s30, %s929_s27  ;;  %p938_p5 = scmp.lt.s32.totalorder %s929_s27, %s929_s27 }
  0x4b   : > { %p932_p8 = pnand %p930_p6, %p1149_p13  ;;  %p939_p7 = por %p938_p5, %p937_p3 }
  0x4d   : > { %p933_p0 = pneg %p932_p8 }
  0x4f   : > { %p940_p10 = pnand %p939_p7, %p933_p0 }
  0x51   : > { %943 = shalt.err (!%p940_p10)
}
  0x52   : > { %s1053_s7 = smov 128   ;;  %s1054_s10 = smov 8  }
  0x53   : > { %788 = dma.hbm_to_vmem [thread:$0]  (!%p1133_p11), %s1426_s3, 1024, %s1139_s30, [#allocation9], %s1053_s7, %s1053_s7, %s1054_s10  }
  0x54   : > { %s1216_s25 = sadd.s32 1, %s1048_s18   ;;  %s29_s12 = sadd.s32 1, %s1044_s17 }
  0x55   : > { %s26_s11 = ssub.s32 %s1048_s18, %s1216_s25  ;;  %p36_p9 = scmp.ne.s32.totalorder %s1044_s17, %s1040_s16 }
  0x56   : > { %p27_p13 = scmp.eq.s32.totalorder %s26_s11, 0  ;;  %p37_p12 = scmp.eq.s32.totalorder %s1048_s18, 0 }
  0x57   : > { %p800_p2 = scmp.lt.s32.totalorder %s1048_s18, 2  ;;  %p1436_p4 = scmp.eq.s32.totalorder %s1105_s19, 1 }
  0x58   : > { %s1226_s13 = scalar_select %p27_p13, %s1044_s17, %s29_s12  }
  0x59   : > { %p38_p1 = por %p37_p12, %p36_p9  ;;  %p1230_p6 = por %p1436_p4, %p36_p9 }
  0x5a   : > { %s190_s14 = sand.u32 1, %s1044_s17   ;;  %s693_s20 = sshll.u32 %s1048_s18, 10 }
  0x5b   : > { %s669_s30 = sshll.u32 %s190_s14, 6  ;;  %s1239_s29 = scalar_lea.hbm %s1423_s0, %s693_s20 }
  0x5c   : > { %s194_s5 = scalar_lea.vmem [#allocation2], %s669_s30  ;;  %p1241_p11 = pnand %p800_p2, %p38_p1 }
  0x5d   : > { %s201_s6 = sshll.u32 %s194_s5, 4  ;;  %s1247_s8 = scalar_lea.sflag [#allocation3], %s190_s14  ;;  %s1245_s6 = int_to_ptr.vmem [resolvable:$true] %s201_s6 }
  0x5e   : > { %s944_s9 = scalar_lea.hbm %s1239_s29, 1024  ;;  %p946_p0 = pneg %p1241_p11 }
  0x5f   : > { %p945_p8 = scmp.ne.s32.totalorder %s1239_s29, %s944_s9  ;;  %s949_s20 = scalar_lea.hbm %s1423_s0, 2048 }
  0x60   : > { %p950_p7 = scmp.lt.u32.totalorder %s1239_s29, %s1423_s0  ;;  %p951_p10 = scmp.lt.u32.totalorder %s949_s20, %s944_s9 }
  0x61   : > { %p947_p3 = pnand %p946_p0, %p945_p8  ;;  %p953_p9 = scmp.lt.u32.totalorder %s944_s9, %s1239_s29 }
  0x62   : > { %p952_p13 = por %p951_p10, %p950_p7 }
  0x63   : > { %p948_p5 = pneg %p947_p3 }
  0x64   : > { %p954_p12 = por %p953_p9, %p952_p13 }
  0x66   : > { %p955_p2 = pnand %p954_p12, %p948_p5 }
  0x68   : > { %958 = shalt.err (!%p955_p2)
}
  0x69   : > { %s959_s14 = scalar_lea.vmem %s1245_s6, 1024  ;;  %s1055_s26 = smov [#allocation2]  }
  0x6a   : > { %p960_p1 = scmp.ne.s32.totalorder %s1245_s6, %s959_s14  ;;  %s964_s5 = sshll.u32 %s1055_s26, 4  ;;  %s965_s5 = int_to_ptr.vmem [resolvable:$false] %s964_s5 }
  0x6b   : > { %s966_s11 = scalar_lea.vmem %s965_s5, 2048  ;;  %p967_p3 = scmp.lt.s32.totalorder %s1245_s6, %s965_s5 }
  0x6c   : > { %p962_p4 = pnand %p960_p1, %p946_p0  ;;  %p968_p7 = scmp.lt.s32.totalorder %s966_s11, %s959_s14 }
  0x6e   : > { %p963_p8 = pneg %p962_p4  ;;  %p969_p10 = por %p968_p7, %p967_p3 }
  0x70   : > { %p970_p13 = pnand %p969_p10, %p963_p8 }
  0x72   : > { %973 = shalt.err (!%p970_p13)
}
  0x73   : > { %792 = dma.hbm_to_vmem [thread:$0]  (!%p1241_p11), %s1239_s29, 1024, %s1245_s6, %s1247_s8, %s1053_s7, %s1053_s7, %s1054_s10  }
  0x74   : > { %p1439_p0 = scmp.ne.s32.totalorder %s1433_s23, 0 }
  0x75   : > { %s1281_s9 = sand.u32 (!%p1439_p0), 1, %s1040_s16   ;;  %p1440_p5 = scmp.ne.s32.totalorder (!%p1439_p0), %s1431_s21, 0 }
  0x76   : > { %213 = sbr.rel (%p1439_p0) target bundleno = 691 (0x2b3), region = 36  ;;  %s673_s12 = sshll.u32 (!%p1439_p0), %s1281_s9, 6 }
  0x77   : > { %s216_s20 = scalar_lea.sflag (!%p1439_p0), [#allocation3], %s1281_s9  ;;  %s219_s27 = scalar_lea.vmem (!%p1439_p0), [#allocation2], %s673_s12 }
  0x7d   : > { %1019 = dma.done.wait (%p1440_p5), %s216_s20, 1024  }
  0x7e   : > { %1021 = vsyncadd (%p1440_p5), %s216_s20, 4294966272  ;;  %p1441_p11 = scmp.eq.s32.totalorder %s1105_s19, 0 }
  0x80   : > { %1023 = dma.done.wait (%p1441_p11), [#allocation6], 32   ;;  %p1442_p9 = pmov %p1441_p11 }
  0x82   : > { %1025 = vsyncadd (%p1442_p9), [#allocation6], 4294967264  ;;  %p1443_p12 = pmov %p1442_p9 }
  0x83   : > { %p1444_p2 = pmov %p1442_p9 }
  0x84   : > { %1027 = dma.done.wait (%p1443_p12), [#allocation9], 1024  }
  0x85   : > { %1029 = vsyncadd (%p1444_p2), [#allocation9], 4294966272  ;;  %vm266_vm0 = vcmask 523264   ;;  %v258_v0 = vld [vmem:[%s219_s27] sm:$0xff]  ;;  %v259_v1 = vld [vmem:[%s219_s27 + $0x8] sm:$0xff]  ;;  %s255_s21 = scalar_lea.vmem [#allocation10], %s673_s12 }
  0x86   : > { %v262_v2 = vld [vmem:[%s219_s27 + $0x20] sm:$0xff]  ;;  %v267_v3 = vsel %vm266_vm0, %v258_v0, 0.0  ;;  %v270_v4 = vsel %vm266_vm0, %v259_v1, 0.0  ;;  %v263_v5 = vld [vmem:[%s219_s27 + $0x28] sm:$0xff]  ;;  %v260_v8 = vld [vmem:[%s219_s27 + $0x10] sm:$0xff]  ;;  %s561_s23 = sshll.u32 %s255_s21, 4  ;;  %s1370_s23 = int_to_ptr.vmem [resolvable:$true] %s561_s23 }
  0x87   : > { %268 = vadd.xlane.f32.xlu0 %v267_v3  ;;  %271 = vadd.xlane.f32.xlu1 %v270_v4  ;;  %v279_v6 = vsel %vm266_vm0, %v262_v2, 0.0  ;;  %v282_v7 = vsel %vm266_vm0, %v263_v5, 0.0  ;;  %v264_v9 = vld [vmem:[%s219_s27 + $0x30] sm:$0xff]  ;;  %v273_v10 = vsel %vm266_vm0, %v260_v8, 0.0  ;;  %v261_v12 = vld [vmem:[%s219_s27 + $0x18] sm:$0xff]  ;;  %v402_v56 = vld [vmem:[#allocation8] sm:$0xff] }
  0x88   : > { %v285_v11 = vsel %vm266_vm0, %v264_v9, 0.0  ;;  %v265_v13 = vld [vmem:[%s219_s27 + $0x38] sm:$0xff]  ;;  %v276_v14 = vsel %vm266_vm0, %v261_v12, 0.0  ;;  %v403_v57 = vld [vmem:[#allocation8 + $0x8] sm:$0xff]  ;;  %v406_v62 = vld [vmem:[#allocation8 + $0x20] sm:$0xff]  ;;  %s694_s7 = sshll.u32 %s1105_s19, 10 }
  0x89   : > { %v288_v15 = vsel %vm266_vm0, %v265_v13, 0.0  ;;  %v739_v58 = vpack.c.bf16 %v403_v57, %v402_v56  ;;  %v404_v59 = vld [vmem:[#allocation8 + $0x10] sm:$0xff]  ;;  %v405_v60 = vld [vmem:[#allocation8 + $0x18] sm:$0xff]  ;;  %v407_v63 = vld [vmem:[#allocation8 + $0x28] sm:$0xff]  ;;  %s1377_s6 = scalar_lea.hbm %s1427_s4, %s694_s7  ;;  %s548_s19 = scalar_lea.sflag [#allocation4], %s1281_s9 }
  0x8a   : > { %v743_v61 = vpack.c.bf16 %v405_v60, %v404_v59  ;;  %s974_s8 = scalar_lea.vmem %s1370_s23, 1024  ;;  %s1056_s30 = smov [#allocation10]  }
  0x8b   : > { %280 = vadd.xlane.f32.xlu0 %v279_v6  ;;  %283 = vadd.xlane.f32.xlu1 %v282_v7  ;;  %p975_p1 = scmp.ne.s32.totalorder %s1370_s23, %s974_s8  ;;  %s978_s24 = sshll.u32 %s1056_s30, 4  ;;  %s979_s24 = int_to_ptr.vmem [resolvable:$false] %s978_s24 }
  0x8c   : > { %740 = vmatprep.subr.bf16.mxu0 %v739_v58  ;;  %755 = vmatprep.subr.bf16.mxu1 %v739_v58  ;;  %s980_s14 = scalar_lea.vmem %s979_s24, 2048  ;;  %p981_p3 = scmp.lt.s32.totalorder %s1370_s23, %s979_s24 }
  0x8d   : > { %742 = vmatpush3.bf16.msra.mxu0 %v739_v58  ;;  %759 = vmatpush3.bf16.msra.mxu1 %v739_v58  ;;  %p976_p4 = pnand %p975_p1, %p1230_p6  ;;  %p982_p7 = scmp.lt.s32.totalorder %s980_s14, %s974_s8 }
  0x8e   : > { %744 = vmatprep.subr.bf16.mxu0 %v743_v61  ;;  %756 = vmatprep.subr.bf16.mxu1 %v743_v61 }
  0x8f   : > { %274 = vadd.xlane.f32.xlu0 %v273_v10  ;;  %286 = vadd.xlane.f32.xlu1 %v285_v11  ;;  %p977_p8 = pneg %p976_p4  ;;  %p983_p10 = por %p982_p7, %p981_p3 }
  0x91   : > { %746 = vmatpush3.bf16.msra.mxu0 %v743_v61  ;;  %760 = vmatpush3.bf16.msra.mxu1 %v743_v61  ;;  %p984_p13 = pnand %p983_p10, %p977_p8 }
  0x93   : > { %277 = vadd.xlane.f32.xlu0 %v276_v14  ;;  %289 = vadd.xlane.f32.xlu1 %v288_v15 }
 0x114   : > { %v269_v16 = vpop.xlane.xlu0 %268  ;;  %v272_v17 = vpop.xlane.xlu1 %271 }
 0x115   : > { %v292_v18 = vmul.f32 0.015625, %v269_v16  ;;  %v293_v19 = vmul.f32 0.015625, %v272_v17 }
 0x117   : > { %v1307_v20 = vsub.f32 %v258_v0, %v292_v18  ;;  %v1309_v21 = vsub.f32 %v259_v1, %v293_v19  ;;  %v747_v0 = vpack.c.bf16 %v407_v63, %v406_v62  ;;  %v408_v1 = vld [vmem:[#allocation8 + $0x30] sm:$0xff] }
 0x118   : > { %v281_v22 = vpop.xlane.xlu0 %280  ;;  %v284_v23 = vpop.xlane.xlu1 %283 }
 0x119   : > { %v296_v24 = vmul.f32 0.015625, %v281_v22  ;;  %v297_v25 = vmul.f32 0.015625, %v284_v23  ;;  %v308_v26 = vmul.f32 %v1307_v20, %v1307_v20  ;;  %v309_v27 = vmul.f32 %v1309_v21, %v1309_v21  ;;  %748 = vmatprep.subr.bf16.mxu0 %v747_v0  ;;  %757 = vmatprep.subr.bf16.mxu1 %v747_v0 }
 0x11a   : > { %750 = vmatpush3.bf16.msra.mxu0 %v747_v0  ;;  %761 = vmatpush3.bf16.msra.mxu1 %v747_v0 }
 0x11b   : > { %v1315_v28 = vsub.f32 %v262_v2, %v296_v24  ;;  %v1317_v29 = vsub.f32 %v263_v5, %v297_v25  ;;  %v316_v30 = vsel %vm266_vm0, %v308_v26, 0.0  ;;  %v319_v33 = vsel %vm266_vm0, %v309_v27, 0.0  ;;  %v409_v2 = vld [vmem:[#allocation8 + $0x38] sm:$0xff] }
 0x11c   : > { %317 = vadd.xlane.f32.xlu0 %v316_v30  ;;  %v275_v31 = vpop.xlane.xlu0 %274  ;;  %v287_v32 = vpop.xlane.xlu1 %286  ;;  %v751_v3 = vpack.c.bf16 %v409_v2, %v408_v1  ;;  %v678_v30 = vld [vmem:[#allocation5] ss:$0 sm:$0xff] }
 0x11d   : > { %v294_v34 = vmul.f32 0.015625, %v275_v31  ;;  %v298_v35 = vmul.f32 0.015625, %v287_v32  ;;  %v312_v36 = vmul.f32 %v1315_v28, %v1315_v28  ;;  %v313_v37 = vmul.f32 %v1317_v29, %v1317_v29 }
 0x11e   : > { %752 = vmatprep.subr.bf16.mxu0 %v751_v3  ;;  %758 = vmatprep.subr.bf16.mxu1 %v751_v3 }
 0x11f   : > { %v1325_v38 = vsub.f32 %v260_v8, %v294_v34  ;;  %v1327_v39 = vsub.f32 %v264_v9, %v298_v35  ;;  %v328_v40 = vsel %vm266_vm0, %v312_v36, 0.0  ;;  %v331_v43 = vsel %vm266_vm0, %v313_v37, 0.0  ;;  %754 = vmatpush3.bf16.msra.mxu0 %v751_v3  ;;  %762 = vmatpush3.bf16.msra.mxu1 %v751_v3  ;;  %v679_v34 = vld [vmem:[#allocation7] ss:$0 sm:$0xff] }
 0x120   : > { %320 = vadd.xlane.f32.xlu0 %v319_v33  ;;  %329 = vadd.xlane.f32.xlu1 %v328_v40  ;;  %v278_v41 = vpop.xlane.xlu0 %277  ;;  %v290_v42 = vpop.xlane.xlu1 %289 }
 0x121   : > { %v295_v44 = vmul.f32 0.015625, %v278_v41  ;;  %v299_v45 = vmul.f32 0.015625, %v290_v42  ;;  %v310_v46 = vmul.f32 %v1325_v38, %v1325_v38  ;;  %v314_v47 = vmul.f32 %v1327_v39, %v1327_v39 }
 0x123   : > { %v1335_v48 = vsub.f32 %v261_v12, %v295_v44  ;;  %v1337_v49 = vsub.f32 %v265_v13, %v299_v45  ;;  %v322_v50 = vsel %vm266_vm0, %v310_v46, 0.0  ;;  %v334_v51 = vsel %vm266_vm0, %v314_v47, 0.0 }
 0x124   : > { %332 = vadd.xlane.f32.xlu1 %v331_v43  ;;  %323 = vadd.xlane.f32.xlu0 %v322_v50 }
 0x125   : > { %v311_v52 = vmul.f32 %v1335_v48, %v1335_v48  ;;  %v315_v53 = vmul.f32 %v1337_v49, %v1337_v49 }
 0x127   : > { %v325_v54 = vsel %vm266_vm0, %v311_v52, 0.0  ;;  %v337_v55 = vsel %vm266_vm0, %v315_v53, 0.0 }
 0x128   : > { %335 = vadd.xlane.f32.xlu1 %v334_v51  ;;  %326 = vadd.xlane.f32.xlu0 %v325_v54 }
 0x12c   : > { %338 = vadd.xlane.f32.xlu1 %v337_v55 }
 0x1a9   : > { %v318_v4 = vpop.xlane.xlu0 %317 }
 0x1aa   : > { %v340_v5 = vmul.f32 0.015625, %v318_v4 }
 0x1ac   : > { %v348_v6 = vadd.f32 1e-05, %v340_v5 }
 0x1ad   : > { %v330_v7 = vpop.xlane.xlu1 %329  ;;  %v321_v8 = vpop.xlane.xlu0 %320 }
 0x1ae   : > { %844 = vrsqrt.f32 %v348_v6  ;;  %v344_v9 = vmul.f32 0.015625, %v330_v7  ;;  %v341_v10 = vmul.f32 0.015625, %v321_v8 }
 0x1b0   : > { %v352_v11 = vadd.f32 1e-05, %v344_v9  ;;  %v349_v12 = vadd.f32 1e-05, %v341_v10 }
 0x1b1   : > { %v333_v13 = vpop.xlane.xlu1 %332  ;;  %v324_v14 = vpop.xlane.xlu0 %323 }
 0x1b2   : > { %846 = vrsqrt.f32 %v352_v11  ;;  %v345_v15 = vmul.f32 0.015625, %v333_v13  ;;  %v342_v16 = vmul.f32 0.015625, %v324_v14 }
 0x1b3   : > { %848 = vrsqrt.f32 %v349_v12 }
 0x1b4   : > { %v353_v17 = vadd.f32 1e-05, %v345_v15  ;;  %v350_v18 = vadd.f32 1e-05, %v342_v16 }
 0x1b5   : > { %v336_v19 = vpop.xlane.xlu1 %335  ;;  %v327_v22 = vpop.xlane.xlu0 %326 }
 0x1b6   : > { %850 = vrsqrt.f32 %v353_v17  ;;  %v346_v23 = vmul.f32 0.015625, %v336_v19  ;;  %v343_v24 = vmul.f32 0.015625, %v327_v22 }
 0x1b7   : > { %852 = vrsqrt.f32 %v350_v18 }
 0x1b8   : > { %v845_v25 = vpop.eup %844  ;;  %v354_v26 = vadd.f32 1e-05, %v346_v23  ;;  %v351_v27 = vadd.f32 1e-05, %v343_v24 }
 0x1b9   : > { %v339_v31 = vpop.xlane.xlu1 %338  ;;  %v364_v32 = vmul.f32 %v845_v25, %v1307_v20 }
 0x1ba   : > { %854 = vrsqrt.f32 %v354_v26  ;;  %v347_v33 = vmul.f32 0.015625, %v339_v31 }
 0x1bb   : > { %856 = vrsqrt.f32 %v351_v27  ;;  %v379_v35 = vmul.f32 %v678_v30, %v364_v32 }
 0x1bc   : > { %v847_v36 = vpop.eup %846  ;;  %v355_v37 = vadd.f32 1e-05, %v347_v33 }
 0x1bd   : > { %v849_v40 = vpop.eup %848  ;;  %v394_v41 = vadd.f32 %v679_v34, %v379_v35  ;;  %v368_v42 = vmul.f32 %v847_v36, %v1315_v28 }
 0x1be   : > { %858 = vrsqrt.f32 %v355_v37  ;;  %v365_v43 = vmul.f32 %v849_v40, %v1309_v21 }
 0x1bf   : > { %727 = vmatprep.mubr.msk.f32.mxu0 %vm266_vm0, %v394_v41  ;;  %v383_v44 = vmul.f32 %v678_v30, %v368_v42 }
 0x1c0   : > { %v851_v45 = vpop.eup %850  ;;  %v380_v46 = vmul.f32 %v678_v30, %v365_v43 }
 0x1c1   : > { %v853_v20 = vpop.eup %852  ;;  %v398_v47 = vadd.f32 %v679_v34, %v383_v44  ;;  %v369_v50 = vmul.f32 %v851_v45, %v1317_v29 }
 0x1c2   : > { %v395_v51 = vadd.f32 %v679_v34, %v380_v46  ;;  %v366_v52 = vmul.f32 %v853_v20, %v1325_v38 }
 0x1c3   : > { %733 = vmatprep.mubr.msk.f32.mxu1 %vm266_vm0, %v398_v47  ;;  %v384_v53 = vmul.f32 %v678_v30, %v369_v50 }
 0x1c4   : > { %v855_v54 = vpop.eup %854  ;;  %728 = vmatmul.mubr.msk.f32.vlgmr.msra.gmra.mrb[0].mxu0 %vm266_vm0, %v395_v51  ;;  %v381_v28 = vmul.f32 %v678_v30, %v366_v52 }
 0x1c5   : > { %v857_v21 = vpop.eup %856  ;;  %v399_v55 = vadd.f32 %v679_v34, %v384_v53  ;;  %v370_v56 = vmul.f32 %v855_v54, %v1327_v39 }
 0x1c6   : > { %v396_v57 = vadd.f32 %v679_v34, %v381_v28  ;;  %v367_v58 = vmul.f32 %v857_v21, %v1335_v48 }
 0x1c7   : > { %734 = vmatmul.mubr.msk.f32.vlgmr.msra.gmra.mrb[0].mxu1 %vm266_vm0, %v399_v55  ;;  %v385_v29 = vmul.f32 %v678_v30, %v370_v56 }
 0x1c8   : > { %v859_v59 = vpop.eup %858  ;;  %730 = vmatprep.mubr.msk.f32.mxu0 %vm266_vm0, %v396_v57  ;;  %v382_v38 = vmul.f32 %v678_v30, %v367_v58 }
 0x1c9   : > { %v400_v60 = vadd.f32 %v679_v34, %v385_v29  ;;  %v371_v61 = vmul.f32 %v859_v59, %v1337_v49 }
 0x1ca   : > { %v397_v62 = vadd.f32 %v679_v34, %v382_v38 }
 0x1cb   : > { %736 = vmatprep.mubr.msk.f32.mxu1 %vm266_vm0, %v400_v60  ;;  %v386_v63 = vmul.f32 %v678_v30, %v371_v61 }
 0x1cc   : > { %731 = vmatmul.mubr.msk.f32.gmra.mrb[2].mxu0 %vm266_vm0, %v397_v62 }
 0x1cd   : > { %v401_v39 = vadd.f32 %v679_v34, %v386_v63 }
 0x1cf   : > { %737 = vmatmul.mubr.msk.f32.gmra.mrb[2].mxu1 %vm266_vm0, %v401_v39 }
 0x297   : > { %v729_v48 = vpop.f32.mrb[0].mxu0 }
 0x298   : > { %540 = vst.msk [vmem:[%s255_s21 + $0x8] sm:$0xff] %vm266_vm0, %v729_v48  ;;  %v500_v0 = vpop.f32.mrb[1].mxu0 }
 0x299   : > { %539 = vst.msk [vmem:[%s255_s21] sm:$0xff] %vm266_vm0, %v500_v0 }
 0x29a   : > { %v735_v1 = vpop.f32.mrb[0].mxu1 }
 0x29b   : > { %544 = vst.msk [vmem:[%s255_s21 + $0x28] sm:$0xff] %vm266_vm0, %v735_v1  ;;  %v520_v49 = vpop.f32.mrb[1].mxu1 }
 0x29c   : > { %543 = vst.msk [vmem:[%s255_s21 + $0x20] sm:$0xff] %vm266_vm0, %v520_v49 }
 0x29f   : > { %v732_v2 = vpop.f32.mrb[2].mxu0 }
 0x2a0   : > { %542 = vst.msk [vmem:[%s255_s21 + $0x18] sm:$0xff] %vm266_vm0, %v732_v2  ;;  %v510_v3 = vpop.f32.mrb[3].mxu0 }
 0x2a1   : > { %541 = vst.msk [vmem:[%s255_s21 + $0x10] sm:$0xff] %vm266_vm0, %v510_v3 }
 0x2a2   : > { %v738_v4 = vpop.f32.mrb[2].mxu1 }
 0x2a3   : > { %546 = vst.msk [vmem:[%s255_s21 + $0x38] sm:$0xff] %vm266_vm0, %v738_v4  ;;  %v530_v5 = vpop.f32.mrb[3].mxu1 }
 0x2a4   : > { %545 = vst.msk [vmem:[%s255_s21 + $0x30] sm:$0xff] %vm266_vm0, %v530_v5 }
 0x2a5   : > { %987 = shalt.err (!%p984_p13)
}
 0x2a6   : > { %s988_s26 = scalar_lea.hbm %s1377_s6, 1024  ;;  %s992_s12 = scalar_lea.hbm %s1427_s4, 2048 }
 0x2a7   : > { %p989_p0 = scmp.ne.s32.totalorder %s1377_s6, %s988_s26  ;;  %p993_p9 = scmp.lt.u32.totalorder %s1377_s6, %s1427_s4 }
 0x2a8   : > { %p994_p12 = scmp.lt.u32.totalorder %s992_s12, %s988_s26  ;;  %p996_p1 = scmp.lt.u32.totalorder %s988_s26, %s1377_s6 }
 0x2a9   : > { %p990_p5 = pnand %p989_p0, %p1230_p6 }
 0x2aa   : > { %p995_p2 = por %p994_p12, %p993_p9 }
 0x2ab   : > { %p991_p11 = pneg %p990_p5 }
 0x2ac   : > { %p997_p4 = por %p996_p1, %p995_p2 }
 0x2ae   : > { %p998_p8 = pnand %p997_p4, %p991_p11 }
 0x2b0   : > { %1001 = shalt.err (!%p998_p8)
}
 0x2b1   : > { %s1057_s21 = smov 128   ;;  %s1058_s7 = smov 8  }
 0x2b2   : > { %777 = dma.vmem_to_hbm [thread:$0]  (%p1230_p6), %s1370_s23, 1024, %s1377_s6, %s548_s19, %s1057_s21, %s1057_s21, %s1058_s7  }
 0x2b3 PF: > { %s576_s10 = sand.u32 1, %s1036_s15   ;;  %p1445_p3 = scmp.ne.s32.totalorder %s1432_s22, 0 }
 0x2b4   : > { %p1446_p7 = scmp.ge.s32.totalorder %s1048_s18, 2  ;;  %s577_s29 = scalar_lea.sflag [#allocation4], %s576_s10 }
 0x2b6   : > { %p794_p10 = pnand %p1446_p7, %p1445_p3 }
 0x2b8   : > { %1031 = dma.done.wait (!%p794_p10), %s577_s29, 1024  }
 0x2b9   : > { %1033 = vsyncadd (!%p794_p10), %s577_s29, 4294966272  ;;  %p19_p13 = scmp.ge.s32.totalorder %s1216_s25, 4   ;;  %s1447_s15 = smov %s1040_s16 }
 0x2ba   : > { %s1448_s16 = smov %s1044_s17  ;;  %s1449_s17 = smov %s1226_s13 }
 0x2bb   : > { %s1450_s18 = smov %s1216_s25  ;;  %21 = sbr.rel (!%p19_p13) target bundleno = 7 (0x7), region = 93 }
 0x2c2   :  { %582 = vsyncpa [#allocation3], 1 }
 0x2c3   :  { %584 = vsyncpa [#allocation3 + $0x1], 1 }
 0x2c4   :  { %585 = vsyncpa [#allocation6], 1 }
 0x2c5   :  { %586 = vsyncpa [#allocation9], 1 }
 0x2c6   :  { %587 = vsyncpa [#allocation4], 1 }
 0x2c7   :  { %589 = vsyncpa [#allocation4 + $0x1], 1 }

</bundles_post_ra>
